<compile_context>
chip_gen: v5e
topology: v5e:2x2
jax: 0.10.0
libtpu: 0.0.40
codegen_flags: <defaults>
</compile_context>

<pallas_src>
import functools

import jax
import jax.numpy as jnp
import numpy as np
from jax import lax
from jax.experimental import pallas as pl
from jax.experimental.pallas import tpu as pltpu


def _layernorm_rows_kernel(x_ref, w_ref, b_ref, o_ref, *, eps):
    # x_ref: (tile_m, C) with C on the lane axis; w_ref/b_ref: (1, C).
    x = x_ref[...].astype(jnp.float32)
    mean = jnp.mean(x, axis=-1, keepdims=True)
    xc = x - mean
    var = jnp.mean(xc * xc, axis=-1, keepdims=True)          # biased variance (matches torch)
    inv = lax.rsqrt(var + eps)                                # EUP rsqrt
    y = xc * inv
    y = y * w_ref[...].astype(jnp.float32) + b_ref[...].astype(jnp.float32)
    o_ref[...] = y.astype(o_ref.dtype)


def _layernorm_rows(x2d, weight, bias, eps, *, tile_m=256):
    """LayerNorm over the last axis of a (M, C) array."""
    M, C = x2d.shape
    tile_m = min(tile_m, M)
    if tile_m != M:
        tile_m = max(8, (tile_m // 8) * 8)                    # sublane-aligned row tile
    grid = (pl.cdiv(M, tile_m),)
    w2d = weight.reshape(1, C)
    b2d = bias.reshape(1, C)
    kernel = functools.partial(_layernorm_rows_kernel, eps=eps)
    return pl.pallas_call(
        kernel,
        out_shape=jax.ShapeDtypeStruct((M, C), x2d.dtype),
        grid_spec=pltpu.PrefetchScalarGridSpec(
            num_scalar_prefetch=0,
            grid=grid,
            in_specs=[
                pl.BlockSpec((tile_m, C), lambda i: (i, 0)),  # activations, lane-dense
                pl.BlockSpec((1, C), lambda i: (0, 0)),       # weight (resident)
                pl.BlockSpec((1, C), lambda i: (0, 0)),       # bias   (resident)
            ],
            out_specs=pl.BlockSpec((tile_m, C), lambda i: (i, 0)),
        ),
        compiler_params=pltpu.CompilerParams(
            dimension_semantics=("parallel",),                # rows independent -> v7x megacore
        ),
    )(x2d, w2d, b2d)


def layernorm_forward(x, weight, bias, *, eps=1e-6, data_format="channels_last"):
    if data_format == "channels_last":
        C = x.shape[-1]
        lead = x.shape[:-1]
        M = int(np.prod(lead)) if lead else 1
        y2d = _layernorm_rows(x.reshape(M, C), weight, bias, eps)
        return y2d.reshape(x.shape)
    elif data_format == "channels_first":
        # Put C on the lane axis in the wrapper (NCHW -> rows of C), reuse the same kernel.
        N, C, H, W = x.shape
        x_rows = jnp.transpose(x, (0, 2, 3, 1)).reshape(N * H * W, C)
        y2d = _layernorm_rows(x_rows, weight, bias, eps)
        return jnp.transpose(y2d.reshape(N, H, W, C), (0, 3, 1, 2))
    else:
        raise NotImplementedError(data_format)


def reference_forward(x, weight, bias, *, eps=1e-6, data_format="channels_last"):
    """Pure-JAX reference mirroring the PyTorch module."""
    xf = x.astype(jnp.float32)
    w = weight.astype(jnp.float32)
    b = bias.astype(jnp.float32)
    if data_format == "channels_last":
        u = xf.mean(-1, keepdims=True)
        s = ((xf - u) ** 2).mean(-1, keepdims=True)
        xn = (xf - u) / jnp.sqrt(s + eps)
        return xn * w + b
    else:
        u = xf.mean(1, keepdims=True)
        s = ((xf - u) ** 2).mean(1, keepdims=True)
        xn = (xf - u) / jnp.sqrt(s + eps)
        return w[:, None, None] * xn + b[:, None, None]


if __name__ == "__main__":
    key = jax.random.PRNGKey(0)
    kx1, kx2, kw, kb = jax.random.split(key, 4)

    N, H, W, C = 2, 16, 16, 128
    weight = 1.0 + 0.1 * jax.random.normal(kw, (C,), jnp.float32)
    bias = 0.1 * jax.random.normal(kb, (C,), jnp.float32)

    # channels_last: (N, H, W, C)
    x_last = jax.random.normal(kx1, (N, H, W, C), jnp.float32)
    y_last = layernorm_forward(x_last, weight, bias, eps=1e-6, data_format="channels_last")
    jax.block_until_ready(y_last)
    ref_last = reference_forward(x_last, weight, bias, eps=1e-6, data_format="channels_last")
    np.testing.assert_allclose(np.asarray(y_last), np.asarray(ref_last), rtol=1e-5, atol=1e-5)

    # channels_first: (N, C, H, W)
    x_first = jax.random.normal(kx2, (N, C, H, W), jnp.float32)
    y_first = layernorm_forward(x_first, weight, bias, eps=1e-6, data_format="channels_first")
    jax.block_until_ready(y_first)
    ref_first = reference_forward(x_first, weight, bias, eps=1e-6, data_format="channels_first")
    np.testing.assert_allclose(np.asarray(y_first), np.asarray(ref_first), rtol=1e-5, atol=1e-5)

    print("KERNEL_OK")
</pallas_src>

<mosaic_0001>
module attributes {stable_mosaic.version = 11 : i64} {
  func.func @_layernorm_rows_kernel(%arg0: i32, %arg1: memref<256x128xf32, #tpu.memory_space<vmem>>, %arg2: memref<1x128xf32, #tpu.memory_space<vmem>>, %arg3: memref<1x128xf32, #tpu.memory_space<vmem>>, %arg4: memref<256x128xf32, #tpu.memory_space<vmem>>) attributes {dimension_semantics = [#tpu.dimension_semantics<parallel>], iteration_bounds = array<i64: 2>, scalar_prefetch = 0 : i64, scratch_operands = 0 : i64, tpu.core_type = #tpu.core_type<tc>, window_params = [{transform_indices = @transform_0, window_bounds = array<i64: 256, 128>}, {pipeline_mode = #tpu.pipeline_mode<synchronous>, transform_indices = @transform_1, window_bounds = array<i64: 1, 128>}, {pipeline_mode = #tpu.pipeline_mode<synchronous>, transform_indices = @transform_2, window_bounds = array<i64: 1, 128>}, {transform_indices = @transform_3, window_bounds = array<i64: 256, 128>}]} {
    %c0 = arith.constant 0 : index
    %c0_0 = arith.constant 0 : index
    %0 = vector.load %arg1[%c0, %c0_0] : memref<256x128xf32, #tpu.memory_space<vmem>>, vector<256x128xf32>
    %cst = arith.constant dense<0.000000e+00> : vector<256xf32>
    %1 = vector.multi_reduction <add>, %0, %cst [1] : vector<256x128xf32> to vector<256xf32>
    %2 = vector.shape_cast %1 : vector<256xf32> to vector<256x1xf32>
    %cst_1 = arith.constant 1.280000e+02 : f32
    %3 = vector.broadcast %cst_1 : f32 to vector<256x1xf32>
    %4 = arith.divf %2, %3 : vector<256x1xf32>
    %5 = vector.broadcast %4 : vector<256x1xf32> to vector<256x128xf32>
    %6 = arith.subf %0, %5 : vector<256x128xf32>
    %7 = arith.mulf %6, %6 : vector<256x128xf32>
    %cst_2 = arith.constant dense<0.000000e+00> : vector<256xf32>
    %8 = vector.multi_reduction <add>, %7, %cst_2 [1] : vector<256x128xf32> to vector<256xf32>
    %9 = vector.shape_cast %8 : vector<256xf32> to vector<256x1xf32>
    %cst_3 = arith.constant 1.280000e+02 : f32
    %10 = vector.broadcast %cst_3 : f32 to vector<256x1xf32>
    %11 = arith.divf %9, %10 : vector<256x1xf32>
    %cst_4 = arith.constant 9.99999997E-7 : f32
    %12 = vector.broadcast %cst_4 : f32 to vector<256x1xf32>
    %13 = arith.addf %11, %12 : vector<256x1xf32>
    %14 = math.rsqrt %13 : vector<256x1xf32>
    %15 = vector.broadcast %14 : vector<256x1xf32> to vector<256x128xf32>
    %16 = arith.mulf %6, %15 : vector<256x128xf32>
    %c0_5 = arith.constant 0 : index
    %c0_6 = arith.constant 0 : index
    %17 = vector.load %arg2[%c0_5, %c0_6] : memref<1x128xf32, #tpu.memory_space<vmem>>, vector<1x128xf32>
    %18 = vector.broadcast %17 : vector<1x128xf32> to vector<256x128xf32>
    %19 = arith.mulf %16, %18 : vector<256x128xf32>
    %c0_7 = arith.constant 0 : index
    %c0_8 = arith.constant 0 : index
    %20 = vector.load %arg3[%c0_7, %c0_8] : memref<1x128xf32, #tpu.memory_space<vmem>>, vector<1x128xf32>
    %21 = vector.broadcast %20 : vector<1x128xf32> to vector<256x128xf32>
    %22 = arith.addf %19, %21 : vector<256x128xf32>
    %c0_9 = arith.constant 0 : index
    %c0_10 = arith.constant 0 : index
    %23 = vector.load %arg4[%c0_9, %c0_10] : memref<256x128xf32, #tpu.memory_space<vmem>>, vector<256x128xf32>
    tpu.vector_store %arg4[%c0_9, %c0_10], %22 {strides = array<i32>} : memref<256x128xf32, #tpu.memory_space<vmem>>, vector<256x128xf32>,
    return
  }
  func.func @transform_0(%arg0: i32) -> (i32, i32) {
    %c0_i32 = arith.constant 0 : i32
    %c0_i32_0 = arith.constant 0 : i32
    return %arg0, %c0_i32 : i32, i32
  }
  func.func @transform_1(%arg0: i32) -> (i32, i32) {
    %c0_i32 = arith.constant 0 : i32
    %c0_i32_0 = arith.constant 0 : i32
    %c0_i32_1 = arith.constant 0 : i32
    return %c0_i32, %c0_i32_0 : i32, i32
  }
  func.func @transform_2(%arg0: i32) -> (i32, i32) {
    %c0_i32 = arith.constant 0 : i32
    %c0_i32_0 = arith.constant 0 : i32
    %c0_i32_1 = arith.constant 0 : i32
    return %c0_i32, %c0_i32_0 : i32, i32
  }
  func.func @transform_3(%arg0: i32) -> (i32, i32) {
    %c0_i32 = arith.constant 0 : i32
    %c0_i32_0 = arith.constant 0 : i32
    return %arg0, %c0_i32 : i32, i32
  }
}

</mosaic_0001>

<bundles_post_ra>
// kernel: tpu_custom_call.1
= control target key start
LH: loop header
LB: loop body
LE: loop exit
PB: predicated region body
PF: predicated region fallthrough
CT: control target
= control target key end

     0   :  { %8 = vsyncpa [#allocation3], 0  ;;  %s2498_s0 = inlined_call_operand.hbm [shape: f32[512,128], index: 0, kind: input, shape index: {}]   ;;  %s2499_s1 = inlined_call_operand.hbm [shape: f32[1,128], index: 1, kind: input, shape index: {}]   ;;  %s2500_s2 = inlined_call_operand.vmem [shape: f32[1,128], index: 2, kind: input, shape index: {}]   ;;  %s2501_s3 = inlined_call_operand.hbm [shape: f32[512,128], index: 3, kind: output, shape index: {}]  }
   0x1   :  { %10 = vsyncpa [#allocation3 + $0x1], 0 }
   0x2   :  { %11 = vsyncpa [#allocation6], 0 }
   0x3   :  { %12 = vsyncpa [#allocation4], 0 }
   0x4   :  { %14 = vsyncpa [#allocation4 + $0x1], 0  ;;  %s1398_s12 = smov 0   ;;  %s1400_s13 = smov 0  }
   0x5   :  { %s1402_s14 = smov 0   ;;  %s1404_s15 = smov 0  }
   0x6 LB: > { %s1419_s16 = sadd.s32 4294967295, %s1370_s15   ;;  %s1090_s17 = sadd.s32 4294967294, %s1370_s15   ;;  %s1370_s15 = sphi %s1404_s15, %s2532_s15   ;;  %s1366_s14 = sphi %s1402_s14, %s2531_s14   ;;  %s1362_s13 = sphi %s1400_s13, %s2530_s13   ;;  %s1358_s12 = sphi %s1398_s12, %s2529_s12  }
   0x7   : > { %s1423_s18 = sadd.s32 1, %s1370_s15   ;;  %s27_s19 = sadd.s32 1, %s1366_s14 }
   0x8   : > { %s24_s20 = ssub.s32 %s1370_s15, %s1423_s18  ;;  %p34_p0 = scmp.ne.s32.totalorder %s1366_s14, %s1362_s13 }
   0x9   : > { %p25_p1 = scmp.eq.s32.totalorder %s24_s20, 0  ;;  %p35_p2 = scmp.eq.s32.totalorder %s1370_s15, 0 }
   0xa   : > { %p40_p3 = scmp.ne.s32.totalorder %s1362_s13, %s1358_s12  ;;  %p41_p4 = scmp.eq.s32.totalorder %s1419_s16, 0 }
   0xb   : > { %s1435_s21 = scalar_select %p25_p1, %s1366_s14, %s27_s19  }
   0xc   : > { %p1437_p5 = por %p35_p2, %p34_p0  ;;  %p1443_p6 = por %p41_p4, %p40_p3 }
   0xd   : > { %p106_p7 = scmp.eq.s32.totalorder %s1419_s16, 1  ;;  %p112_p8 = scmp.eq.s32.totalorder %s1090_s17, 1 }
   0xe   : > { %p1091_p9 = scmp.ge.s32.totalorder %s1370_s15, 1  ;;  %p119_p10 = scmp.lt.s32.totalorder %s1370_s15, 3 }
   0xf   : > { %p1450_p11 = por %p106_p7, %p34_p0  ;;  %p1454_p12 = por %p112_p8, %p40_p3 }
  0x10   : > { %p1458_p13 = pnand %p1091_p9, %p119_p10  ;;  %s131_s29 = sshll.u32 %s2499_s1, 4  ;;  %s132_s29 = int_to_ptr.hbm [resolvable:$true] %s131_s29 }
  0x11   : > { %s1372_s30 = smov [#allocation5]   ;;  %p1129_p3 = scmp.lt.s32.totalorder %s1370_s15, 2 }
  0x12   : > { %p1116_p1 = pneg %p1458_p13  ;;  %s133_s4 = sshll.u32 %s1372_s30, 4  ;;  %s134_s4 = int_to_ptr.vmem [resolvable:$true] %s133_s4 }
  0x13   : > { %s147_s5 = sand.u32 1, %s1366_s14   ;;  %p1474_p7 = pnand %p1129_p3, %p1437_p5 }
  0x14   : > { %p1117_p2 = pnand %p1116_p1, %p41_p4  ;;  %s1094_s7 = sshll.u32 %s147_s5, 8 }
  0x15   : > { %s1106_s8 = sshll.u32 %s1370_s15, 8  ;;  %s151_s19 = scalar_lea.vmem [#allocation2], %s1094_s7 }
  0x16   : > { %1119 = dma.hbm_to_vmem [thread:$0]  (!%p1117_p2), %s132_s29, 16, %s134_s4, [#allocation6]  }
  0x17   : > { %s156_s11 = scalar_lea.hbm %s2498_s0, %s1106_s8  ;;  %s159_s20 = sshll.u32 %s151_s19, 4  ;;  %s160_s20 = int_to_ptr.vmem [resolvable:$true] %s159_s20 }
  0x18   : > { %s157_s17 = sshll.u32 %s156_s11, 4  ;;  %s148_s27 = scalar_lea.sflag [#allocation3], %s147_s5  ;;  %s158_s17 = int_to_ptr.hbm [resolvable:$true] %s157_s17 }
  0x19   : > { %s1270_s28 = sshra.s32 %s158_s17, 4  ;;  %p1274_p8 = pneg %p1474_p7  ;;  %s1271_s28 = int_to_ptr.hbm [resolvable:$true] %s1270_s28 }
  0x1a   : > { %s1272_s22 = scalar_lea.hbm %s1271_s28, 256  ;;  %s1277_s4 = scalar_lea.hbm %s2498_s0, 512 }
  0x1b   : > { %p1273_p5 = scmp.ne.s32.totalorder %s1271_s28, %s1272_s22  ;;  %p1278_p1 = scmp.lt.s32.totalorder %s1271_s28, %s2498_s0 }
  0x1c   : > { %p1279_p2 = scmp.lt.s32.totalorder %s1277_s4, %s1272_s22 }
  0x1d   : > { %p1275_p9 = pnand %p1274_p8, %p1273_p5 }
  0x1e   : > { %p1280_p3 = por %p1279_p2, %p1278_p1 }
  0x1f   : > { %p1276_p10 = pneg %p1275_p9 }
  0x21   : > { %p1281_p0 = pnand %p1280_p3, %p1276_p10 }
  0x23   : > { %1284 = shalt.err (!%p1281_p0)
}
  0x24   : > { %s1373_s5 = smov 128   ;;  %s1374_s7 = smov 8  }
  0x25   : > { %1123 = dma.hbm_to_vmem [thread:$0]  (!%p1474_p7), %s158_s17, 4096, %s160_s20, %s148_s27, %s1373_s5, %s1373_s5, %s1374_s7  }
  0x26   : > { %171 = sbr.rel (%p1458_p13) target bundleno = 421 (0x1a5), region = 32  ;;  %s1495_s10 = sand.u32 (!%p1458_p13), 1, %s1362_s13  }
  0x27   : > { %s1098_s11 = sshll.u32 (!%p1458_p13), %s1495_s10, 8  ;;  %s174_s19 = scalar_lea.sflag (!%p1458_p13), [#allocation3], %s1495_s10 }
  0x28   : > { %s1501_s28 = scalar_lea.vmem (!%p1458_p13), [#allocation2], %s1098_s11 }
  0x2b   : > { %1345 = dma.done.wait (%p1443_p6), %s174_s19, 4096  }
  0x2c   : > { %1347 = vsyncadd (%p1443_p6), %s174_s19, 4294963200 }
  0x2d   : > { %1349 = dma.done.wait (%p41_p4), [#allocation6], 16  }
  0x2e   : > { %1351 = vsyncadd (%p41_p4), [#allocation6], 4294967280  ;;  %v1512_v0 = vld [vmem:[%s1501_s28 + $0x20] sm:$0xff]  ;;  %v1515_v1 = vld [vmem:[%s1501_s28 + $0x10] sm:$0xff]  ;;  %v1375_v32 = vmov 128.0   ;;  %s1913_s6 = scalar_lea.vmem [#allocation7], %s1098_s11 }
  0x2f   : > { %v1518_v2 = vld [vmem:[%s1501_s28] sm:$0xff]  ;;  %248 = vadd.xlane.f32.xlu2 %v1512_v0  ;;  %244 = vadd.xlane.f32.xlu1 %v1515_v1  ;;  %v1524_v3 = vld [vmem:[%s1501_s28 + $0x28] sm:$0xff]  ;;  %v1527_v4 = vld [vmem:[%s1501_s28 + $0x18] sm:$0xff]  ;;  %1172 = vrcp.f32 %v1375_v32  ;;  %s1107_s17 = sshll.u32 %s1419_s16, 8  ;;  %s1004_s22 = sshll.u32 %s1913_s6, 4  ;;  %s1005_s22 = int_to_ptr.vmem [resolvable:$true] %s1004_s22 }
  0x30   : > { %240 = vadd.xlane.f32.xlu0 %v1518_v2  ;;  %v1530_v5 = vld [vmem:[%s1501_s28 + $0x8] sm:$0xff]  ;;  %v1536_v6 = vld [vmem:[%s1501_s28 + $0x40] sm:$0xff]  ;;  %v1539_v7 = vld [vmem:[%s1501_s28 + $0x38] sm:$0xff]  ;;  %s1003_s27 = scalar_lea.hbm %s2501_s3, %s1107_s17  ;;  %s992_s9 = scalar_lea.sflag [#allocation4], %s1495_s10 }
  0x31   : > { %v1542_v8 = vld [vmem:[%s1501_s28 + $0x30] sm:$0xff]  ;;  %v1548_v9 = vld [vmem:[%s1501_s28 + $0x58] sm:$0xff]  ;;  %v1554_v11 = vld [vmem:[%s1501_s28 + $0x48] sm:$0xff]  ;;  %s1006_s29 = sshll.u32 %s1003_s27, 4  ;;  %s1320_s19 = scalar_lea.hbm %s2501_s3, 512  ;;  %s1007_s29 = int_to_ptr.hbm [resolvable:$true] %s1006_s29 }
  0x32   : > { %v1551_v10 = vld [vmem:[%s1501_s28 + $0x50] sm:$0xff]  ;;  %v1563_v13 = vld [vmem:[%s1501_s28 + $0x68] sm:$0xff]  ;;  %v1566_v14 = vld [vmem:[%s1501_s28 + $0x60] sm:$0xff]  ;;  %s1314_s8 = sshra.s32 %s1007_s29, 4  ;;  %s1315_s8 = int_to_ptr.hbm [resolvable:$true] %s1314_s8 }
  0x33   : > { %v1560_v12 = vld [vmem:[%s1501_s28 + $0x70] sm:$0xff]  ;;  %v1572_v15 = vld [vmem:[%s1501_s28 + $0x88] sm:$0xff]  ;;  %v1575_v16 = vld [vmem:[%s1501_s28 + $0x80] sm:$0xff]  ;;  %s1316_s5 = scalar_lea.hbm %s1315_s8, 256  ;;  %p1321_p0 = scmp.lt.s32.totalorder %s1315_s8, %s2501_s3 }
  0x34   : > { %v1578_v17 = vld [vmem:[%s1501_s28 + $0x78] sm:$0xff]  ;;  %v1584_v18 = vld [vmem:[%s1501_s28 + $0xa0] sm:$0xff]  ;;  %v1590_v20 = vld [vmem:[%s1501_s28 + $0x90] sm:$0xff]  ;;  %p1317_p4 = scmp.ne.s32.totalorder %s1315_s8, %s1316_s5  ;;  %p1322_p7 = scmp.lt.s32.totalorder %s1320_s19, %s1316_s5 }
  0x35   : > { %v1587_v19 = vld [vmem:[%s1501_s28 + $0x98] sm:$0xff]  ;;  %v1599_v22 = vld [vmem:[%s1501_s28 + $0xb0] sm:$0xff]  ;;  %v1602_v23 = vld [vmem:[%s1501_s28 + $0xa8] sm:$0xff]  ;;  %v1173_v33 = vpop.eup %1172 }
  0x36   : > { %v1596_v21 = vld [vmem:[%s1501_s28 + $0xb8] sm:$0xff]  ;;  %v1608_v24 = vld [vmem:[%s1501_s28 + $0xd0] sm:$0xff]  ;;  %v1611_v25 = vld [vmem:[%s1501_s28 + $0xc8] sm:$0xff]  ;;  %v305_v34 = vmul.f32 128.0, %v1173_v33  ;;  %vm309_vm0 = vweird.f32 %v1173_v33  ;;  %p1318_p6 = pnand %p1317_p4, %p1450_p11  ;;  %p1323_p5 = por %p1322_p7, %p1321_p0 }
  0x37   : > { %250 = vadd.xlane.f32.xlu2 %v1524_v3  ;;  %246 = vadd.xlane.f32.xlu1 %v1527_v4  ;;  %v1614_v26 = vld [vmem:[%s1501_s28 + $0xc0] sm:$0xff]  ;;  %v1620_v27 = vld [vmem:[%s1501_s28 + $0xe8] sm:$0xff]  ;;  %v1626_v29 = vld [vmem:[%s1501_s28 + $0xd8] sm:$0xff] }
  0x38   : > { %242 = vadd.xlane.f32.xlu0 %v1530_v5  ;;  %v1623_v28 = vld [vmem:[%s1501_s28 + $0xe0] sm:$0xff]  ;;  %v1632_v30 = vld [vmem:[%s1501_s28 + $0xf8] sm:$0xff]  ;;  %v1635_v31 = vld [vmem:[%s1501_s28 + $0xf0] sm:$0xff]  ;;  %v306_v35 = vsub.f32 1.0, %v305_v34  ;;  %p1319_p13 = pneg %p1318_p6 }
  0x3a   : > { %v307_v36 = vmul.f32 %v1173_v33, %v306_v35  ;;  %p1324_p8 = pnand %p1323_p5, %p1319_p13 }
  0x3c   : > { %v308_v37 = vadd.f32 %v1173_v33, %v307_v36 }
  0x3e   : > { %v1639_v38 = vsel %vm309_vm0, %v1173_v33, %v308_v37 }
  0x3f   : > { %256 = vadd.xlane.f32.xlu2 %v1536_v6  ;;  %254 = vadd.xlane.f32.xlu1 %v1539_v7 }
  0x40   : > { %252 = vadd.xlane.f32.xlu0 %v1542_v8 }
  0x47   : > { %262 = vadd.xlane.f32.xlu2 %v1548_v9  ;;  %260 = vadd.xlane.f32.xlu1 %v1551_v10 }
  0x48   : > { %258 = vadd.xlane.f32.xlu0 %v1554_v11 }
  0x4f   : > { %268 = vadd.xlane.f32.xlu2 %v1560_v12  ;;  %266 = vadd.xlane.f32.xlu1 %v1563_v13 }
  0x50   : > { %264 = vadd.xlane.f32.xlu0 %v1566_v14 }
  0x57   : > { %274 = vadd.xlane.f32.xlu2 %v1572_v15  ;;  %272 = vadd.xlane.f32.xlu1 %v1575_v16 }
  0x58   : > { %270 = vadd.xlane.f32.xlu0 %v1578_v17 }
  0x5f   : > { %280 = vadd.xlane.f32.xlu2 %v1584_v18  ;;  %278 = vadd.xlane.f32.xlu1 %v1587_v19 }
  0x60   : > { %276 = vadd.xlane.f32.xlu0 %v1590_v20 }
  0x67   : > { %286 = vadd.xlane.f32.xlu2 %v1596_v21  ;;  %284 = vadd.xlane.f32.xlu1 %v1599_v22 }
  0x68   : > { %282 = vadd.xlane.f32.xlu0 %v1602_v23 }
  0x6f   : > { %292 = vadd.xlane.f32.xlu2 %v1608_v24  ;;  %290 = vadd.xlane.f32.xlu1 %v1611_v25 }
  0x70   : > { %288 = vadd.xlane.f32.xlu0 %v1614_v26 }
  0x77   : > { %298 = vadd.xlane.f32.xlu2 %v1620_v27  ;;  %296 = vadd.xlane.f32.xlu1 %v1623_v28 }
  0x78   : > { %294 = vadd.xlane.f32.xlu0 %v1626_v29 }
  0x7f   : > { %302 = vadd.xlane.f32.xlu1 %v1632_v30 }
  0x80   : > { %300 = vadd.xlane.f32.xlu0 %v1635_v31 }
  0xa2   : > { %v249_v39 = vpop.xlane.xlu2 %248  ;;  %v245_v40 = vpop.xlane.xlu1 %244 }
  0xa3   : > { %v313_v41 = vmul.f32 %v1639_v38, %v245_v40  ;;  %v241_v42 = vpop.xlane.xlu0 %240  ;;  %v315_v56 = vmul.f32 %v1639_v38, %v249_v39 }
  0xa4   : > { %v311_v43 = vmul.f32 %v1639_v38, %v241_v42 }
  0xa5   : > { %v1644_v44 = vsub.f32 %v1515_v1, %v313_v41  ;;  %v1673_v61 = vsub.f32 %v1512_v0, %v315_v56 }
  0xa6   : > { %v1647_v45 = vsub.f32 %v1518_v2, %v311_v43 }
  0xa7   : > { %v377_v46 = vmul.f32 %v1644_v44, %v1644_v44  ;;  %v379_v32 = vmul.f32 %v1673_v61, %v1673_v61 }
  0xa8   : > { %v375_v47 = vmul.f32 %v1647_v45, %v1647_v45 }
  0xa9   : > { %411 = vadd.xlane.f32.xlu1 %v377_v46 }
  0xaa   : > { %407 = vadd.xlane.f32.xlu2 %v375_v47  ;;  %v251_v48 = vpop.xlane.xlu2 %250  ;;  %v247_v49 = vpop.xlane.xlu1 %246 }
  0xab   : > { %v316_v50 = vmul.f32 %v1639_v38, %v251_v48  ;;  %v314_v51 = vmul.f32 %v1639_v38, %v247_v49  ;;  %v243_v52 = vpop.xlane.xlu0 %242 }
  0xac   : > { %v312_v53 = vmul.f32 %v1639_v38, %v243_v52 }
  0xad   : > { %v1657_v54 = vsub.f32 %v1524_v3, %v316_v50  ;;  %v1660_v55 = vsub.f32 %v1527_v4, %v314_v51 }
  0xae   : > { %v1664_v57 = vsub.f32 %v1530_v5, %v312_v53 }
  0xaf   : > { %v380_v58 = vmul.f32 %v1657_v54, %v1657_v54  ;;  %v378_v59 = vmul.f32 %v1660_v55, %v1660_v55 }
  0xb0   : > { %v376_v60 = vmul.f32 %v1664_v57, %v1664_v57 }
  0xb1   : > { %417 = vadd.xlane.f32.xlu1 %v380_v58 }
  0xb2   : > { %413 = vadd.xlane.f32.xlu2 %v378_v59  ;;  %409 = vadd.xlane.f32.xlu0 %v376_v60  ;;  %v257_v62 = vpop.xlane.xlu2 %256  ;;  %v255_v63 = vpop.xlane.xlu1 %254 }
  0xb3   : > { %v319_v1 = vmul.f32 %v1639_v38, %v257_v62  ;;  %v253_v2 = vpop.xlane.xlu0 %252  ;;  %v318_v0 = vmul.f32 %v1639_v38, %v255_v63 }
  0xb4   : > { %v317_v3 = vmul.f32 %v1639_v38, %v253_v2 }
  0xb5   : > { %v1678_v4 = vsub.f32 %v1536_v6, %v319_v1  ;;  %v1691_v6 = vsub.f32 %v1539_v7, %v318_v0 }
  0xb6   : > { %v1681_v5 = vsub.f32 %v1542_v8, %v317_v3 }
  0xb7   : > { %v383_v33 = vmul.f32 %v1678_v4, %v1678_v4  ;;  %v382_v42 = vmul.f32 %v1691_v6, %v1691_v6 }
  0xb8   : > { %v381_v34 = vmul.f32 %v1681_v5, %v1681_v5 }
  0xb9   : > { %423 = vadd.xlane.f32.xlu1 %v383_v33 }
  0xba   : > { %415 = vadd.xlane.f32.xlu0 %v379_v32  ;;  %419 = vadd.xlane.f32.xlu2 %v381_v34  ;;  %v263_v35 = vpop.xlane.xlu2 %262  ;;  %v261_v8 = vpop.xlane.xlu1 %260 }
  0xbb   : > { %v322_v36 = vmul.f32 %v1639_v38, %v263_v35  ;;  %v259_v37 = vpop.xlane.xlu0 %258  ;;  %v321_v43 = vmul.f32 %v1639_v38, %v261_v8 }
  0xbc   : > { %v320_v39 = vmul.f32 %v1639_v38, %v259_v37 }
  0xbd   : > { %v1696_v40 = vsub.f32 %v1548_v9, %v322_v36  ;;  %v1709_v9 = vsub.f32 %v1551_v10, %v321_v43 }
  0xbe   : > { %v1699_v41 = vsub.f32 %v1554_v11, %v320_v39 }
  0xbf   : > { %v386_v7 = vmul.f32 %v1696_v40, %v1696_v40  ;;  %v385_v53 = vmul.f32 %v1709_v9, %v1709_v9 }
  0xc0   : > { %v384_v46 = vmul.f32 %v1699_v41, %v1699_v41 }
  0xc1   : > { %429 = vadd.xlane.f32.xlu1 %v386_v7 }
  0xc2   : > { %421 = vadd.xlane.f32.xlu0 %v382_v42  ;;  %425 = vadd.xlane.f32.xlu2 %v384_v46  ;;  %v269_v47 = vpop.xlane.xlu2 %268  ;;  %v267_v11 = vpop.xlane.xlu1 %266 }
  0xc3   : > { %v325_v48 = vmul.f32 %v1639_v38, %v269_v47  ;;  %v265_v49 = vpop.xlane.xlu0 %264  ;;  %v324_v56 = vmul.f32 %v1639_v38, %v267_v11 }
  0xc4   : > { %v323_v50 = vmul.f32 %v1639_v38, %v265_v49 }
  0xc5   : > { %v1714_v51 = vsub.f32 %v1560_v12, %v325_v48  ;;  %v1727_v12 = vsub.f32 %v1563_v13, %v324_v56 }
  0xc6   : > { %v1717_v52 = vsub.f32 %v1566_v14, %v323_v50 }
  0xc7   : > { %v389_v10 = vmul.f32 %v1714_v51, %v1714_v51  ;;  %v388_v3 = vmul.f32 %v1727_v12, %v1727_v12 }
  0xc8   : > { %v387_v58 = vmul.f32 %v1717_v52, %v1717_v52 }
  0xc9   : > { %435 = vadd.xlane.f32.xlu1 %v389_v10 }
  0xca   : > { %427 = vadd.xlane.f32.xlu0 %v385_v53  ;;  %431 = vadd.xlane.f32.xlu2 %v387_v58  ;;  %v275_v59 = vpop.xlane.xlu2 %274  ;;  %v273_v14 = vpop.xlane.xlu1 %272 }
  0xcb   : > { %v328_v60 = vmul.f32 %v1639_v38, %v275_v59  ;;  %v271_v62 = vpop.xlane.xlu0 %270  ;;  %v327_v32 = vmul.f32 %v1639_v38, %v273_v14 }
  0xcc   : > { %v326_v63 = vmul.f32 %v1639_v38, %v271_v62 }
  0xcd   : > { %v1732_v1 = vsub.f32 %v1572_v15, %v328_v60  ;;  %v1745_v15 = vsub.f32 %v1575_v16, %v327_v32 }
  0xce   : > { %v1735_v2 = vsub.f32 %v1578_v17, %v326_v63 }
  0xcf   : > { %v392_v13 = vmul.f32 %v1732_v1, %v1732_v1  ;;  %v391_v39 = vmul.f32 %v1745_v15, %v1745_v15 }
  0xd0   : > { %v390_v0 = vmul.f32 %v1735_v2, %v1735_v2 }
  0xd1   : > { %441 = vadd.xlane.f32.xlu1 %v392_v13 }
  0xd2   : > { %433 = vadd.xlane.f32.xlu0 %v388_v3  ;;  %437 = vadd.xlane.f32.xlu2 %v390_v0  ;;  %v281_v33 = vpop.xlane.xlu2 %280  ;;  %v279_v17 = vpop.xlane.xlu1 %278 }
  0xd3   : > { %v331_v34 = vmul.f32 %v1639_v38, %v281_v33  ;;  %v277_v35 = vpop.xlane.xlu0 %276  ;;  %v330_v42 = vmul.f32 %v1639_v38, %v279_v17 }
  0xd4   : > { %v329_v8 = vmul.f32 %v1639_v38, %v277_v35 }
  0xd5   : > { %v1750_v36 = vsub.f32 %v1584_v18, %v331_v34  ;;  %v1763_v18 = vsub.f32 %v1587_v19, %v330_v42 }
  0xd6   : > { %v1753_v37 = vsub.f32 %v1590_v20, %v329_v8 }
  0xd7   : > { %v395_v16 = vmul.f32 %v1750_v36, %v1750_v36  ;;  %v394_v50 = vmul.f32 %v1763_v18, %v1763_v18 }
  0xd8   : > { %v393_v43 = vmul.f32 %v1753_v37, %v1753_v37 }
  0xd9   : > { %447 = vadd.xlane.f32.xlu1 %v395_v16 }
  0xda   : > { %439 = vadd.xlane.f32.xlu0 %v391_v39  ;;  %443 = vadd.xlane.f32.xlu2 %v393_v43  ;;  %v287_v7 = vpop.xlane.xlu2 %286  ;;  %v285_v20 = vpop.xlane.xlu1 %284 }
  0xdb   : > { %v334_v46 = vmul.f32 %v1639_v38, %v287_v7  ;;  %v283_v47 = vpop.xlane.xlu0 %282  ;;  %v333_v53 = vmul.f32 %v1639_v38, %v285_v20 }
  0xdc   : > { %v332_v11 = vmul.f32 %v1639_v38, %v283_v47 }
  0xdd   : > { %v1768_v48 = vsub.f32 %v1596_v21, %v334_v46  ;;  %v1781_v21 = vsub.f32 %v1599_v22, %v333_v53 }
  0xde   : > { %v1771_v49 = vsub.f32 %v1602_v23, %v332_v11 }
  0xdf   : > { %v398_v19 = vmul.f32 %v1768_v48, %v1768_v48  ;;  %v397_v63 = vmul.f32 %v1781_v21, %v1781_v21 }
  0xe0   : > { %v396_v56 = vmul.f32 %v1771_v49, %v1771_v49 }
  0xe1   : > { %453 = vadd.xlane.f32.xlu1 %v398_v19 }
  0xe2   : > { %445 = vadd.xlane.f32.xlu0 %v394_v50  ;;  %449 = vadd.xlane.f32.xlu2 %v396_v56  ;;  %v293_v10 = vpop.xlane.xlu2 %292  ;;  %v291_v23 = vpop.xlane.xlu1 %290 }
  0xe3   : > { %v337_v58 = vmul.f32 %v1639_v38, %v293_v10  ;;  %v289_v59 = vpop.xlane.xlu0 %288  ;;  %v336_v3 = vmul.f32 %v1639_v38, %v291_v23 }
  0xe4   : > { %v335_v14 = vmul.f32 %v1639_v38, %v289_v59 }
  0xe5   : > { %v1786_v60 = vsub.f32 %v1608_v24, %v337_v58  ;;  %v1799_v24 = vsub.f32 %v1611_v25, %v336_v3 }
  0xe6   : > { %v1789_v62 = vsub.f32 %v1614_v26, %v335_v14 }
  0xe7   : > { %v401_v22 = vmul.f32 %v1786_v60, %v1786_v60  ;;  %v400_v8 = vmul.f32 %v1799_v24, %v1799_v24 }
  0xe8   : > { %v399_v32 = vmul.f32 %v1789_v62, %v1789_v62 }
  0xe9   : > { %459 = vadd.xlane.f32.xlu1 %v401_v22 }
  0xea   : > { %451 = vadd.xlane.f32.xlu0 %v397_v63  ;;  %455 = vadd.xlane.f32.xlu2 %v399_v32  ;;  %v299_v13 = vpop.xlane.xlu2 %298  ;;  %v297_v26 = vpop.xlane.xlu1 %296 }
  0xeb   : > { %v340_v0 = vmul.f32 %v1639_v38, %v299_v13  ;;  %v295_v33 = vpop.xlane.xlu0 %294  ;;  %v339_v39 = vmul.f32 %v1639_v38, %v297_v26 }
  0xec   : > { %v338_v17 = vmul.f32 %v1639_v38, %v295_v33 }
  0xed   : > { %v1804_v34 = vsub.f32 %v1620_v27, %v340_v0  ;;  %v1817_v27 = vsub.f32 %v1623_v28, %v339_v39 }
  0xee   : > { %v1807_v35 = vsub.f32 %v1626_v29, %v338_v17 }
  0xef   : > { %v404_v25 = vmul.f32 %v1804_v34, %v1804_v34  ;;  %v403_v20 = vmul.f32 %v1817_v27, %v1817_v27 }
  0xf0   : > { %v402_v42 = vmul.f32 %v1807_v35, %v1807_v35 }
  0xf1   : > { %465 = vadd.xlane.f32.xlu1 %v404_v25 }
  0xf2   : > { %457 = vadd.xlane.f32.xlu0 %v400_v8  ;;  %461 = vadd.xlane.f32.xlu2 %v402_v42  ;;  %v303_v29 = vpop.xlane.xlu1 %302 }
  0xf3   : > { %v301_v16 = vpop.xlane.xlu0 %300  ;;  %v342_v46 = vmul.f32 %v1639_v38, %v303_v29 }
  0xf4   : > { %v341_v43 = vmul.f32 %v1639_v38, %v301_v16 }
  0xf5   : > { %v1829_v28 = vsub.f32 %v1632_v30, %v342_v46 }
  0xf6   : > { %v1821_v7 = vsub.f32 %v1635_v31, %v341_v43 }
  0xf7   : > { %v406_v11 = vmul.f32 %v1829_v28, %v1829_v28 }
  0xf8   : > { %v405_v47 = vmul.f32 %v1821_v7, %v1821_v7 }
  0xfa   : > { %463 = vadd.xlane.f32.xlu0 %v403_v20  ;;  %467 = vadd.xlane.f32.xlu2 %v405_v47 }
 0x102   : > { %469 = vadd.xlane.f32.xlu0 %v406_v11 }
 0x11c   : > { %v412_v50 = vpop.xlane.xlu1 %411 }
 0x11d   : > { %v473_v31 = vmul.f32 %v412_v50, %v1639_v38  ;;  %v408_v53 = vpop.xlane.xlu2 %407 }
 0x11e   : > { %v471_v19 = vmul.f32 %v408_v53, %v1639_v38 }
 0x11f   : > { %v505_v56 = vadd.f32 1e-06, %v473_v31 }
 0x120   : > { %v503_v10 = vadd.f32 1e-06, %v471_v19 }
 0x121   : > { %1174 = vrsqrt.f32 %v505_v56  ;;  %vm561_vm1 = vweird.f32 %v505_v56 }
 0x122   : > { %1176 = vrsqrt.f32 %v503_v10  ;;  %vm541_vm3 = vweird.f32 %v503_v10 }
 0x124   : > { %v418_v23 = vpop.xlane.xlu1 %417 }
 0x125   : > { %v476_v58 = vmul.f32 %v418_v23, %v1639_v38  ;;  %v414_v59 = vpop.xlane.xlu2 %413  ;;  %v410_v30 = vpop.xlane.xlu0 %409 }
 0x126   : > { %v474_v14 = vmul.f32 %v414_v59, %v1639_v38  ;;  %v472_v63 = vmul.f32 %v410_v30, %v1639_v38  ;;  %v1863_v59 = vld [vmem:[#allocation5] ss:$0 sm:$0xff] }
 0x127   : > { %v1175_v3 = vpop.eup %1174  ;;  %v1838_v22 = vadd.f32 1e-06, %v476_v58 }
 0x128   : > { %v1177_v32 = vpop.eup %1176  ;;  %v556_v13 = vmul.f32 %v1175_v3, %v505_v56  ;;  %v1840_v26 = vadd.f32 1e-06, %v474_v14  ;;  %v1842_v0 = vadd.f32 1e-06, %v472_v63  ;;  %vm562_vm2 = vweird.f32 %v1175_v3  ;;  %v1880_v56 = vld [vmem:[%s2500_s2] ss:$0 sm:$0xff] }
 0x129   : > { %v536_v33 = vmul.f32 %v1177_v32, %v503_v10  ;;  %1178 = vrsqrt.f32 %v1838_v22  ;;  %vm542_vm4 = vweird.f32 %v1177_v32  ;;  %vm591_vm5 = vweird.f32 %v1838_v22  ;;  %vm563_vm7 = vmor %vm561_vm1, %vm562_vm2 }
 0x12a   : > { %v557_v17 = vmul.f32 %v1175_v3, %v556_v13  ;;  %1180 = vrsqrt.f32 %v1840_v26  ;;  %vm571_vm6 = vweird.f32 %v1840_v26  ;;  %vm543_vm8 = vmor %vm541_vm3, %vm542_vm4  ;;  %vm551_vm9 = vweird.f32 %v1842_v0 }
 0x12b   : > { %v537_v8 = vmul.f32 %v1177_v32, %v536_v33  ;;  %1182 = vrsqrt.f32 %v1842_v0 }
 0x12c   : > { %v558_v39 = vmul.f32 0.5, %v557_v17  ;;  %v424_v25 = vpop.xlane.xlu1 %423 }
 0x12d   : > { %v538_v42 = vmul.f32 0.5, %v537_v8  ;;  %v479_v16 = vmul.f32 %v424_v25, %v1639_v38  ;;  %v420_v29 = vpop.xlane.xlu2 %419  ;;  %v416_v43 = vpop.xlane.xlu0 %415 }
 0x12e   : > { %v559_v20 = vsub.f32 1.5, %v558_v39  ;;  %v477_v46 = vmul.f32 %v420_v29, %v1639_v38  ;;  %v475_v63 = vmul.f32 %v416_v43, %v1639_v38 }
 0x12f   : > { %v1849_v47 = vpop.eup %1178  ;;  %v539_v11 = vsub.f32 1.5, %v538_v42  ;;  %v1852_v50 = vadd.f32 1e-06, %v479_v16 }
 0x130   : > { %v1854_v31 = vpop.eup %1180  ;;  %v560_v53 = vmul.f32 %v1175_v3, %v559_v20  ;;  %v586_v19 = vmul.f32 %v1849_v47, %v1838_v22  ;;  %v1859_v23 = vadd.f32 1e-06, %v477_v46  ;;  %vm592_vm10 = vweird.f32 %v1849_v47 }
 0x131   : > { %v1861_v58 = vpop.eup %1182  ;;  %v540_v30 = vmul.f32 %v1177_v32, %v539_v11  ;;  %v566_v14 = vmul.f32 %v1854_v31, %v1840_v26  ;;  %1184 = vrsqrt.f32 %v1852_v50  ;;  %vm572_vm11 = vweird.f32 %v1854_v31  ;;  %vm1901_vm12 = vmor %vm591_vm5, %vm592_vm10 }
 0x132   : > { %v564_v13 = vsel %vm563_vm7, %v1175_v3, %v560_v53  ;;  %v587_v33 = vmul.f32 %v1849_v47, %v586_v19  ;;  %v546_v17 = vmul.f32 %v1861_v58, %v1842_v0  ;;  %1186 = vrsqrt.f32 %v1859_v23  ;;  %vm573_vm0 = vmor %vm571_vm6, %vm572_vm11 }
 0x133   : > { %v857_v8 = vmul.f32 %v564_v13, %v1644_v44  ;;  %v544_v39 = vsel %vm543_vm8, %v1177_v32, %v540_v30  ;;  %v567_v10 = vmul.f32 %v1854_v31, %v566_v14  ;;  %v1890_v20 = vadd.f32 1e-06, %v475_v63 }
 0x134   : > { %v855_v3 = vmul.f32 %v544_v39, %v1647_v45  ;;  %v588_v25 = vmul.f32 0.5, %v587_v33  ;;  %v547_v42 = vmul.f32 %v1861_v58, %v546_v17  ;;  %v430_v16 = vpop.xlane.xlu1 %429  ;;  %vm552_vm13 = vweird.f32 %v1861_v58 }
 0x135   : > { %v893_v29 = vmul.f32 %v1863_v59, %v857_v8  ;;  %v568_v43 = vmul.f32 0.5, %v567_v10  ;;  %v426_v44 = vpop.xlane.xlu2 %425  ;;  %v422_v32 = vpop.xlane.xlu0 %421  ;;  %v482_v53 = vmul.f32 %v430_v16, %v1639_v38  ;;  %1188 = vrsqrt.f32 %v1890_v20  ;;  %vm553_vm1 = vmor %vm551_vm9, %vm552_vm13 }
 0x136   : > { %v891_v46 = vmul.f32 %v1863_v59, %v855_v3  ;;  %v589_v11 = vsub.f32 1.5, %v588_v25  ;;  %v548_v45 = vmul.f32 0.5, %v547_v42  ;;  %vm621_vm14 = vweird.f32 %v1852_v50 }
 0x137   : > { %v1894_v19 = vpop.eup %1184  ;;  %v929_v30 = vadd.f32 %v1880_v56, %v893_v29  ;;  %v569_v63 = vsub.f32 1.5, %v568_v43  ;;  %v1919_v39 = vadd.f32 1e-06, %v482_v53  ;;  %v480_v16 = vmul.f32 %v426_v44, %v1639_v38 }
 0x138   : > { %v927_v13 = vadd.f32 %v1880_v56, %v891_v46  ;;  %v590_v33 = vmul.f32 %v1849_v47, %v589_v11  ;;  %v549_v17 = vsub.f32 1.5, %v548_v45  ;;  %v616_v8 = vmul.f32 %v1894_v19, %v1852_v50  ;;  %v1921_v10 = vpop.eup %1186 }
 0x139   : > { %961 = vst [vmem:[%s1913_s6 + $0x10] sm:$0xff] %v929_v30  ;;  %v570_v22 = vmul.f32 %v1854_v31, %v569_v63  ;;  %vm622_vm15 = vweird.f32 %v1894_v19  ;;  %v478_v26 = vmul.f32 %v422_v32, %v1639_v38  ;;  %1190 = vrsqrt.f32 %v1919_v39 }
 0x13a   : > { %959 = vst [vmem:[%s1913_s6] sm:$0xff] %v927_v13  ;;  %v594_v3 = vsel %vm1901_vm12, %v1849_v47, %v590_v33  ;;  %v550_v25 = vmul.f32 %v1861_v58, %v549_v17  ;;  %v617_v42 = vmul.f32 %v1894_v19, %v616_v8  ;;  %v596_v47 = vmul.f32 %v1921_v10, %v1859_v23  ;;  %vm1961_vm3 = vmor %vm621_vm14, %vm622_vm15 }
 0x13b   : > { %v860_v29 = vmul.f32 %v594_v3, %v1657_v54  ;;  %v574_v43 = vsel %vm573_vm0, %v1854_v31, %v570_v22  ;;  %v1946_v44 = vpop.eup %1188  ;;  %vm601_vm2 = vweird.f32 %v1859_v23  ;;  %v1965_v17 = vadd.f32 1e-06, %v480_v16 }
 0x13c   : > { %v858_v46 = vmul.f32 %v574_v43, %v1660_v55  ;;  %v554_v11 = vsel %vm553_vm1, %v1861_v58, %v550_v25  ;;  %v618_v45 = vmul.f32 0.5, %v617_v42  ;;  %v436_v54 = vpop.xlane.xlu1 %435  ;;  %v597_v53 = vmul.f32 %v1921_v10, %v596_v47 }
 0x13d   : > { %v896_v31 = vmul.f32 %v1863_v59, %v860_v29  ;;  %v856_v0 = vmul.f32 %v554_v11, %v1664_v57  ;;  %v432_v30 = vpop.xlane.xlu2 %431  ;;  %v428_v14 = vpop.xlane.xlu0 %427  ;;  %v576_v58 = vmul.f32 %v1946_v44, %v1890_v20  ;;  %v1970_v25 = vadd.f32 1e-06, %v478_v26 }
 0x13e   : > { %v894_v32 = vmul.f32 %v1863_v59, %v858_v46  ;;  %v619_v55 = vsub.f32 1.5, %v618_v45  ;;  %v598_v33 = vmul.f32 0.5, %v597_v53  ;;  %vm602_vm4 = vweird.f32 %v1921_v10 }
 0x13f   : > { %v932_v63 = vadd.f32 %v1880_v56, %v896_v31  ;;  %v892_v13 = vmul.f32 %v1863_v59, %v856_v0  ;;  %v577_v3 = vmul.f32 %v1946_v44, %v576_v58  ;;  %1192 = vrsqrt.f32 %v1965_v17  ;;  %v1976_v29 = vpop.eup %1190  ;;  %vm603_vm7 = vmor %vm601_vm2, %vm602_vm4 }
 0x140   : > { %v930_v8 = vadd.f32 %v1880_v56, %v894_v32  ;;  %v620_v22 = vmul.f32 %v1894_v19, %v619_v55  ;;  %v599_v50 = vsub.f32 1.5, %v598_v33  ;;  %vm581_vm5 = vweird.f32 %v1890_v20 }
 0x141   : > { %964 = vst [vmem:[%s1913_s6 + $0x28] sm:$0xff] %v932_v63  ;;  %v928_v42 = vadd.f32 %v1880_v56, %v892_v13  ;;  %v578_v43 = vmul.f32 0.5, %v577_v3  ;;  %1194 = vrsqrt.f32 %v1970_v25  ;;  %vm582_vm6 = vweird.f32 %v1946_v44 }
 0x142   : > { %962 = vst [vmem:[%s1913_s6 + $0x18] sm:$0xff] %v930_v8  ;;  %v624_v16 = vsel %vm1961_vm3, %v1894_v19, %v620_v22  ;;  %v600_v26 = vmul.f32 %v1921_v10, %v599_v50  ;;  %v646_v46 = vmul.f32 %v1976_v29, %v1919_v39  ;;  %v485_v19 = vmul.f32 %v436_v54, %v1639_v38  ;;  %vm583_vm9 = vmor %vm581_vm5, %vm582_vm6 }
 0x143   : > { %960 = vst [vmem:[%s1913_s6 + $0x8] sm:$0xff] %v928_v42  ;;  %v863_v47 = vmul.f32 %v624_v16, %v1678_v4  ;;  %v579_v11 = vsub.f32 1.5, %v578_v43  ;;  %v483_v45 = vmul.f32 %v432_v30, %v1639_v38  ;;  %v481_v31 = vmul.f32 %v428_v14, %v1639_v38 }
 0x144   : > { %v442_v0 = vpop.xlane.xlu1 %441  ;;  %v604_v53 = vsel %vm603_vm7, %v1921_v10, %v600_v26  ;;  %v647_v32 = vmul.f32 %v1976_v29, %v646_v46  ;;  %vm651_vm8 = vweird.f32 %v1919_v39  ;;  %v2002_v30 = vadd.f32 1e-06, %v485_v19 }
 0x145   : > { %v899_v4 = vmul.f32 %v1863_v59, %v863_v47  ;;  %v488_v55 = vmul.f32 %v442_v0, %v1639_v38  ;;  %v438_v58 = vpop.xlane.xlu2 %437  ;;  %v434_v63 = vpop.xlane.xlu0 %433  ;;  %v861_v23 = vmul.f32 %v604_v53, %v1681_v5  ;;  %v580_v54 = vmul.f32 %v1946_v44, %v579_v11 }
 0x146   : > { %v2004_v14 = vpop.eup %1192  ;;  %v648_v10 = vmul.f32 0.5, %v647_v32  ;;  %vm652_vm10 = vweird.f32 %v1976_v29  ;;  %v2012_v57 = vadd.f32 1e-06, %v483_v45  ;;  %v2020_v3 = vadd.f32 1e-06, %v481_v31 }
 0x147   : > { %v935_v13 = vadd.f32 %v1880_v56, %v899_v4  ;;  %v2014_v5 = vpop.eup %1194  ;;  %v897_v33 = vmul.f32 %v1863_v59, %v861_v23  ;;  %v584_v8 = vsel %vm583_vm9, %v1946_v44, %v580_v54  ;;  %v626_v22 = vmul.f32 %v2004_v14, %v1965_v17  ;;  %vm2031_vm11 = vmor %vm651_vm8, %vm652_vm10 }
 0x148   : > { %v859_v20 = vmul.f32 %v584_v8, %v1673_v61  ;;  %v649_v42 = vsub.f32 1.5, %v648_v10  ;;  %v606_v50 = vmul.f32 %v2014_v5, %v1970_v25  ;;  %v2026_v16 = vadd.f32 1e-06, %v488_v55 }
 0x149   : > { %967 = vst [vmem:[%s1913_s6 + $0x40] sm:$0xff] %v935_v13  ;;  %v933_v43 = vadd.f32 %v1880_v56, %v897_v33  ;;  %v627_v47 = vmul.f32 %v2004_v14, %v626_v22  ;;  %vm631_vm12 = vweird.f32 %v1965_v17  ;;  %1196 = vrsqrt.f32 %v2002_v30 }
 0x14a   : > { %v895_v61 = vmul.f32 %v1863_v59, %v859_v20  ;;  %v650_v26 = vmul.f32 %v1976_v29, %v649_v42  ;;  %v607_v46 = vmul.f32 %v2014_v5, %v606_v50  ;;  %1198 = vrsqrt.f32 %v2012_v57 }
 0x14b   : > { %965 = vst [vmem:[%s1913_s6 + $0x30] sm:$0xff] %v933_v43  ;;  %v628_v39 = vmul.f32 0.5, %v627_v47  ;;  %vm632_vm13 = vweird.f32 %v2004_v14  ;;  %vm611_vm14 = vweird.f32 %v1970_v25  ;;  %1200 = vrsqrt.f32 %v2020_v3 }
 0x14c   : > { %v931_v11 = vadd.f32 %v1880_v56, %v895_v61  ;;  %v654_v19 = vsel %vm2031_vm11, %v1976_v29, %v650_v26  ;;  %v608_v45 = vmul.f32 0.5, %v607_v46  ;;  %1202 = vrsqrt.f32 %v2026_v16  ;;  %v448_v31 = vpop.xlane.xlu1 %447  ;;  %vm633_vm3 = vmor %vm631_vm12, %vm632_vm13 }
 0x14d   : > { %v444_v0 = vpop.xlane.xlu2 %443  ;;  %v866_v4 = vmul.f32 %v654_v19, %v1696_v40  ;;  %v629_v53 = vsub.f32 1.5, %v628_v39  ;;  %vm612_vm15 = vweird.f32 %v2014_v5  ;;  %v486_v32 = vmul.f32 %v438_v58, %v1639_v38  ;;  %v440_v55 = vpop.xlane.xlu0 %439 }
 0x14e   : > { %963 = vst [vmem:[%s1913_s6 + $0x20] sm:$0xff] %v931_v11  ;;  %v609_v23 = vsub.f32 1.5, %v608_v45  ;;  %vm681_vm0 = vweird.f32 %v2002_v30  ;;  %vm661_vm1 = vweird.f32 %v2012_v57  ;;  %v484_v29 = vmul.f32 %v434_v63, %v1639_v38  ;;  %vm613_vm4 = vmor %vm611_vm14, %vm612_vm15 }
 0x14f   : > { %v2058_v54 = vpop.eup %1196  ;;  %v902_v13 = vmul.f32 %v1863_v59, %v866_v4  ;;  %v630_v40 = vmul.f32 %v2004_v14, %v629_v53  ;;  %vm711_vm2 = vweird.f32 %v2026_v16  ;;  %v491_v10 = vmul.f32 %v448_v31, %v1639_v38 }
 0x150   : > { %v489_v58 = vmul.f32 %v444_v0, %v1639_v38  ;;  %v2065_v33 = vpop.eup %1198  ;;  %v610_v63 = vmul.f32 %v2014_v5, %v609_v23  ;;  %v676_v8 = vmul.f32 %v2058_v54, %v2002_v30  ;;  %v2074_v22 = vadd.f32 1e-06, %v486_v32 }
 0x151   : > { %v487_v20 = vmul.f32 %v440_v55, %v1639_v38  ;;  %v2077_v42 = vpop.eup %1200  ;;  %v938_v50 = vadd.f32 %v1880_v56, %v902_v13  ;;  %v634_v43 = vsel %vm633_vm3, %v2004_v14, %v630_v40  ;;  %vm682_vm5 = vweird.f32 %v2058_v54 }
 0x152   : > { %v656_v17 = vmul.f32 %v2065_v33, %v2012_v57  ;;  %v1203_v44 = vpop.eup %1202  ;;  %v864_v47 = vmul.f32 %v634_v43, %v1699_v41  ;;  %v614_v61 = vsel %vm613_vm4, %v2014_v5, %v610_v63  ;;  %v677_v26 = vmul.f32 %v2058_v54, %v676_v8  ;;  %vm2110_vm8 = vmor %vm681_vm0, %vm682_vm5 }
 0x153   : > { %v636_v14 = vmul.f32 %v2077_v42, %v2020_v3  ;;  %970 = vst [vmem:[%s1913_s6 + $0x58] sm:$0xff] %v938_v50  ;;  %v862_v46 = vmul.f32 %v614_v61, %v1691_v6  ;;  %v706_v39 = vmul.f32 %v1203_v44, %v2026_v16  ;;  %v2097_v11 = vadd.f32 1e-06, %v484_v29 }
 0x154   : > { %v657_v25 = vmul.f32 %v2065_v33, %v656_v17  ;;  %v900_v19 = vmul.f32 %v1863_v59, %v864_v47  ;;  %v678_v45 = vmul.f32 0.5, %v677_v26  ;;  %vm662_vm6 = vweird.f32 %v2065_v33 }
 0x155   : > { %v637_v41 = vmul.f32 %v2077_v42, %v636_v14  ;;  %v898_v5 = vmul.f32 %v1863_v59, %v862_v46  ;;  %v707_v0 = vmul.f32 %v1203_v44, %v706_v39  ;;  %1204 = vrsqrt.f32 %v2074_v22  ;;  %v2120_v8 = vpop.xlane.xlu0 %445  ;;  %vm2128_vm10 = vmor %vm661_vm1, %vm662_vm6 }
 0x156   : > { %v658_v31 = vmul.f32 0.5, %v657_v25  ;;  %v936_v6 = vadd.f32 %v1880_v56, %v900_v19  ;;  %v679_v4 = vsub.f32 1.5, %v678_v45  ;;  %vm712_vm7 = vweird.f32 %v1203_v44 }
 0x157   : > { %v638_v53 = vmul.f32 0.5, %v637_v41  ;;  %v934_v32 = vadd.f32 %v1880_v56, %v898_v5  ;;  %v708_v29 = vmul.f32 0.5, %v707_v0  ;;  %1206 = vrsqrt.f32 %v2097_v11  ;;  %vm2142_vm12 = vmor %vm711_vm2, %vm712_vm7 }
 0x158   : > { %v659_v23 = vsub.f32 1.5, %v658_v31  ;;  %968 = vst [vmem:[%s1913_s6 + $0x48] sm:$0xff] %v936_v6  ;;  %v680_v13 = vmul.f32 %v2058_v54, %v679_v4  ;;  %vm642_vm9 = vweird.f32 %v2077_v42  ;;  %v2118_v63 = vadd.f32 1e-06, %v491_v10  ;;  %v450_v10 = vpop.xlane.xlu2 %449 }
 0x159   : > { %v639_v40 = vsub.f32 1.5, %v638_v53  ;;  %966 = vst [vmem:[%s1913_s6 + $0x38] sm:$0xff] %v934_v32  ;;  %vm641_vm11 = vweird.f32 %v2020_v3  ;;  %v709_v43 = vsub.f32 1.5, %v708_v29  ;;  %v2133_v17 = vadd.f32 1e-06, %v489_v58  ;;  %v454_v58 = vpop.xlane.xlu1 %453 }
 0x15a   : > { %v660_v30 = vmul.f32 %v2065_v33, %v659_v23  ;;  %v684_v47 = vsel %vm2110_vm8, %v2058_v54, %v680_v13  ;;  %1208 = vrsqrt.f32 %v2118_v63  ;;  %v2147_v3 = vadd.f32 1e-06, %v487_v20  ;;  %vm643_vm13 = vmor %vm641_vm11, %vm642_vm9 }
 0x15b   : > { %v640_v61 = vmul.f32 %v2077_v42, %v639_v40  ;;  %v2149_v26 = vpop.eup %1204  ;;  %v869_v14 = vmul.f32 %v684_v47, %v1714_v51  ;;  %v710_v16 = vmul.f32 %v1203_v44, %v709_v43  ;;  %1210 = vrsqrt.f32 %v2133_v17 }
 0x15c   : > { %v664_v54 = vsel %vm2128_vm10, %v2065_v33, %v660_v30  ;;  %v686_v25 = vmul.f32 %v2149_v26, %v2074_v22  ;;  %vm691_vm14 = vweird.f32 %v2074_v22  ;;  %vm671_vm15 = vweird.f32 %v2097_v11 }
 0x15d   : > { %v867_v46 = vmul.f32 %v664_v54, %v1717_v52  ;;  %v644_v20 = vsel %vm643_vm13, %v2077_v42, %v640_v61  ;;  %v2162_v39 = vpop.eup %1206  ;;  %v905_v51 = vmul.f32 %v1863_v59, %v869_v14  ;;  %v714_v33 = vsel %vm2142_vm12, %v1203_v44, %v710_v16  ;;  %v2196_v40 = vpop.xlane.xlu0 %451 }
 0x15e   : > { %v865_v19 = vmul.f32 %v644_v20, %v1709_v9  ;;  %v872_v52 = vmul.f32 %v714_v33, %v1732_v1  ;;  %v687_v42 = vmul.f32 %v2149_v26, %v686_v25  ;;  %v666_v41 = vmul.f32 %v2162_v39, %v2097_v11 }
 0x15f   : > { %v903_v45 = vmul.f32 %v1863_v59, %v867_v46  ;;  %v941_v9 = vadd.f32 %v1880_v56, %v905_v51  ;;  %vm741_vm0 = vweird.f32 %v2118_v63  ;;  %1212 = vrsqrt.f32 %v2147_v3 }
 0x160   : > { %v901_v5 = vmul.f32 %v1863_v59, %v865_v19  ;;  %v2179_v44 = vpop.eup %1208  ;;  %v908_v31 = vmul.f32 %v1863_v59, %v872_v52  ;;  %v688_v0 = vmul.f32 0.5, %v687_v42  ;;  %v667_v6 = vmul.f32 %v2162_v39, %v666_v41  ;;  %v456_v47 = vpop.xlane.xlu2 %455 }
 0x161   : > { %v939_v1 = vadd.f32 %v1880_v56, %v903_v45  ;;  %v2184_v4 = vpop.eup %1210  ;;  %973 = vst [vmem:[%s1913_s6 + $0x70] sm:$0xff] %v941_v9  ;;  %vm692_vm1 = vweird.f32 %v2149_v26  ;;  %v736_v32 = vmul.f32 %v2179_v44, %v2118_v63  ;;  %vm721_vm2 = vweird.f32 %v2133_v17  ;;  %v460_v54 = vpop.xlane.xlu1 %459 }
 0x162   : > { %v937_v53 = vadd.f32 %v1880_v56, %v901_v5  ;;  %v944_v55 = vadd.f32 %v1880_v56, %v908_v31  ;;  %v689_v23 = vsub.f32 1.5, %v688_v0  ;;  %v668_v29 = vmul.f32 0.5, %v667_v6  ;;  %vm693_vm5 = vmor %vm691_vm14, %vm692_vm1 }
 0x163   : > { %971 = vst [vmem:[%s1913_s6 + $0x60] sm:$0xff] %v939_v1  ;;  %v716_v13 = vmul.f32 %v2184_v4, %v2133_v17  ;;  %vm672_vm3 = vweird.f32 %v2162_v39  ;;  %v737_v30 = vmul.f32 %v2179_v44, %v736_v32  ;;  %v494_v50 = vmul.f32 %v454_v58, %v1639_v38 }
 0x164   : > { %969 = vst [vmem:[%s1913_s6 + $0x50] sm:$0xff] %v937_v53  ;;  %v492_v43 = vmul.f32 %v450_v10, %v1639_v38  ;;  %v690_v61 = vmul.f32 %v2149_v26, %v689_v23  ;;  %v669_v57 = vsub.f32 1.5, %v668_v29  ;;  %vm742_vm4 = vweird.f32 %v2179_v44  ;;  %vm673_vm6 = vmor %vm671_vm15, %vm672_vm3 }
 0x165   : > { %976 = vst [vmem:[%s1913_s6 + $0x88] sm:$0xff] %v944_v55  ;;  %v717_v14 = vmul.f32 %v2184_v4, %v716_v13  ;;  %v1213_v16 = vpop.eup %1212  ;;  %v738_v46 = vmul.f32 0.5, %v737_v30  ;;  %v2211_v58 = vadd.f32 1e-06, %v494_v50  ;;  %v490_v20 = vmul.f32 %v2120_v8, %v1639_v38  ;;  %vm2232_vm7 = vmor %vm741_vm0, %vm742_vm4  ;;  %v2256_v55 = vpop.xlane.xlu0 %457 }
 0x166   : > { %v2213_v10 = vadd.f32 1e-06, %v492_v43  ;;  %v694_v25 = vsel %vm693_vm5, %v2149_v26, %v690_v61  ;;  %v670_v51 = vmul.f32 %v2162_v39, %v669_v57  ;;  %v696_v33 = vmul.f32 %v1213_v16, %v2147_v3 }
 0x167   : > { %v718_v19 = vmul.f32 0.5, %v717_v14  ;;  %v870_v45 = vmul.f32 %v694_v25, %v1735_v2  ;;  %v739_v22 = vsub.f32 1.5, %v738_v46  ;;  %1214 = vrsqrt.f32 %v2211_v58 }
 0x168   : > { %v497_v52 = vmul.f32 %v460_v54, %v1639_v38  ;;  %v674_v8 = vsel %vm673_vm6, %v2162_v39, %v670_v51  ;;  %vm722_vm8 = vweird.f32 %v2184_v4  ;;  %v697_v11 = vmul.f32 %v1213_v16, %v696_v33  ;;  %v462_v29 = vpop.xlane.xlu2 %461 }
 0x169   : > { %v719_v2 = vsub.f32 1.5, %v718_v19  ;;  %v906_v42 = vmul.f32 %v1863_v59, %v870_v45  ;;  %v868_v41 = vmul.f32 %v674_v8, %v1727_v12  ;;  %v740_v9 = vmul.f32 %v2179_v44, %v739_v22  ;;  %vm723_vm10 = vmor %vm721_vm2, %vm722_vm8  ;;  %v466_v54 = vpop.xlane.xlu1 %465 }
 0x16a   : > { %1216 = vrsqrt.f32 %v2213_v10  ;;  %v698_v63 = vmul.f32 0.5, %v697_v11  ;;  %vm702_vm9 = vweird.f32 %v1213_v16  ;;  %v2242_v5 = vadd.f32 1e-06, %v490_v20 }
 0x16b   : > { %v720_v39 = vmul.f32 %v2184_v4, %v719_v2  ;;  %v942_v1 = vadd.f32 %v1880_v56, %v906_v42  ;;  %v904_v31 = vmul.f32 %v1863_v59, %v868_v41  ;;  %v744_v0 = vsel %vm2232_vm7, %v2179_v44, %v740_v9 }
 0x16c   : > { %v2251_v12 = vadd.f32 1e-06, %v497_v52  ;;  %v875_v6 = vmul.f32 %v744_v0, %v1750_v36  ;;  %v699_v32 = vsub.f32 1.5, %v698_v63  ;;  %1218 = vrsqrt.f32 %v2242_v5 }
 0x16d   : > { %v724_v53 = vsel %vm723_vm10, %v2184_v4, %v720_v39  ;;  %v2258_v23 = vpop.eup %1214  ;;  %974 = vst [vmem:[%s1913_s6 + $0x78] sm:$0xff] %v942_v1  ;;  %v940_v44 = vadd.f32 %v1880_v56, %v904_v31  ;;  %vm701_vm11 = vweird.f32 %v2147_v3  ;;  %vm771_vm13 = vweird.f32 %v2211_v58  ;;  %v2320_v39 = vpop.xlane.xlu0 %463 }
 0x16e   : > { %v873_v17 = vmul.f32 %v724_v53, %v1753_v37  ;;  %1220 = vrsqrt.f32 %v2251_v12  ;;  %v911_v36 = vmul.f32 %v1863_v59, %v875_v6  ;;  %v700_v13 = vmul.f32 %v1213_v16, %v699_v32  ;;  %vm703_vm12 = vmor %vm701_vm11, %vm702_vm9 }
 0x16f   : > { %v766_v4 = vmul.f32 %v2258_v23, %v2211_v58  ;;  %972 = vst [vmem:[%s1913_s6 + $0x68] sm:$0xff] %v940_v44  ;;  %v495_v37 = vmul.f32 %v456_v47, %v1639_v38  ;;  %v493_v43 = vmul.f32 %v2196_v40, %v1639_v38  ;;  %vm751_vm14 = vweird.f32 %v2213_v10 }
 0x170   : > { %v2268_v30 = vpop.eup %1216  ;;  %v909_v50 = vmul.f32 %v1863_v59, %v873_v17  ;;  %v947_v3 = vadd.f32 %v1880_v56, %v911_v36  ;;  %v704_v61 = vsel %vm703_vm12, %v1213_v16, %v700_v13  ;;  %vm772_vm15 = vweird.f32 %v2258_v23  ;;  %v468_v31 = vpop.xlane.xlu2 %467 }
 0x171   : > { %v767_v57 = vmul.f32 %v2258_v23, %v766_v4  ;;  %v746_v14 = vmul.f32 %v2268_v30, %v2213_v10  ;;  %v871_v20 = vmul.f32 %v704_v61, %v1745_v15  ;;  %v2284_v47 = vadd.f32 1e-06, %v495_v37  ;;  %vm2310_vm2 = vmor %vm771_vm13, %vm772_vm15 }
 0x172   : > { %v945_v46 = vadd.f32 %v1880_v56, %v909_v50  ;;  %v2286_v25 = vpop.eup %1218  ;;  %979 = vst [vmem:[%s1913_s6 + $0xa0] sm:$0xff] %v947_v3  ;;  %v2291_v51 = vadd.f32 1e-06, %v493_v43  ;;  %vm731_vm0 = vweird.f32 %v2242_v5  ;;  %v500_v45 = vmul.f32 %v466_v54, %v1639_v38 }
 0x173   : > { %v768_v40 = vmul.f32 0.5, %v767_v57  ;;  %v747_v16 = vmul.f32 %v2268_v30, %v746_v14  ;;  %v907_v33 = vmul.f32 %v1863_v59, %v871_v20  ;;  %v726_v15 = vmul.f32 %v2286_v25, %v2242_v5 }
 0x174   : > { %v2293_v19 = vpop.eup %1220  ;;  %977 = vst [vmem:[%s1913_s6 + $0x90] sm:$0xff] %v945_v46  ;;  %1222 = vrsqrt.f32 %v2284_v47  ;;  %vm801_vm1 = vweird.f32 %v2251_v12  ;;  %vm752_vm3 = vweird.f32 %v2268_v30  ;;  %vm732_vm4 = vweird.f32 %v2286_v25 }
 0x175   : > { %v769_v22 = vsub.f32 1.5, %v768_v40  ;;  %v748_v52 = vmul.f32 0.5, %v747_v16  ;;  %v796_v8 = vmul.f32 %v2293_v19, %v2251_v12  ;;  %v943_v26 = vadd.f32 %v1880_v56, %v907_v33  ;;  %vm753_vm7 = vmor %vm751_vm14, %vm752_vm3 }
 0x176   : > { %v727_v11 = vmul.f32 %v2286_v25, %v726_v15  ;;  %1224 = vrsqrt.f32 %v2291_v51  ;;  %vm802_vm5 = vweird.f32 %v2293_v19  ;;  %v2324_v63 = vadd.f32 1e-06, %v500_v45  ;;  %vm733_vm9 = vmor %vm731_vm0, %vm732_vm4 }
 0x177   : > { %v770_v42 = vmul.f32 %v2258_v23, %v769_v22  ;;  %v749_v41 = vsub.f32 1.5, %v748_v52  ;;  %v797_v9 = vmul.f32 %v2293_v19, %v796_v8  ;;  %975 = vst [vmem:[%s1913_s6 + $0x80] sm:$0xff] %v943_v26  ;;  %v498_v1 = vmul.f32 %v462_v29, %v1639_v38  ;;  %vm2353_vm8 = vmor %vm801_vm1, %vm802_vm5  ;;  %v470_v22 = vpop.xlane.xlu0 %469 }
 0x178   : > { %v728_v58 = vmul.f32 0.5, %v727_v11  ;;  %vm781_vm6 = vweird.f32 %v2284_v47  ;;  %1226 = vrsqrt.f32 %v2324_v63  ;;  %v501_v4 = vmul.f32 %v468_v31, %v1639_v38 }
 0x179   : > { %v774_v0 = vsel %vm2310_vm2, %v2258_v23, %v770_v42  ;;  %v750_v6 = vmul.f32 %v2268_v30, %v749_v41  ;;  %v798_v53 = vmul.f32 0.5, %v797_v9  ;;  %v496_v23 = vmul.f32 %v2256_v55, %v1639_v38 }
 0x17a   : > { %v2332_v32 = vpop.eup %1222  ;;  %v878_v44 = vmul.f32 %v774_v0, %v1768_v48  ;;  %v729_v17 = vsub.f32 1.5, %v728_v58  ;;  %vm761_vm10 = vweird.f32 %v2291_v51  ;;  %vm831_vm11 = vweird.f32 %v2324_v63 }
 0x17b   : > { %v754_v29 = vsel %vm753_vm7, %v2268_v30, %v750_v6  ;;  %v799_v36 = vsub.f32 1.5, %v798_v53  ;;  %v776_v13 = vmul.f32 %v2332_v32, %v2284_v47  ;;  %v2357_v30 = vadd.f32 1e-06, %v498_v1 }
 0x17c   : > { %v1225_v48 = vpop.eup %1224  ;;  %v914_v50 = vmul.f32 %v1863_v59, %v878_v44  ;;  %v876_v10 = vmul.f32 %v754_v29, %v1771_v49  ;;  %v730_v37 = vmul.f32 %v2286_v25, %v729_v17  ;;  %vm782_vm12 = vweird.f32 %v2332_v32 }
 0x17d   : > { %v800_v49 = vmul.f32 %v2293_v19, %v799_v36  ;;  %v777_v43 = vmul.f32 %v2332_v32, %v776_v13  ;;  %v756_v3 = vmul.f32 %v1225_v48, %v2291_v51  ;;  %1228 = vrsqrt.f32 %v2357_v30  ;;  %vm783_vm15 = vmor %vm781_vm6, %vm782_vm12 }
 0x17e   : > { %v950_v12 = vadd.f32 %v1880_v56, %v914_v50  ;;  %v912_v61 = vmul.f32 %v1863_v59, %v876_v10  ;;  %v734_v57 = vsel %vm733_vm9, %v2286_v25, %v730_v37  ;;  %v1227_v20 = vpop.eup %1226  ;;  %v2380_v25 = vadd.f32 1e-06, %v496_v23 }
 0x17f   : > { %v874_v5 = vmul.f32 %v734_v57, %v1763_v18  ;;  %v804_v14 = vsel %vm2353_vm8, %v2293_v19, %v800_v49  ;;  %v778_v54 = vmul.f32 0.5, %v777_v43  ;;  %v757_v46 = vmul.f32 %v1225_v48, %v756_v3 }
 0x180   : > { %982 = vst [vmem:[%s1913_s6 + $0xb8] sm:$0xff] %v950_v12  ;;  %v948_v40 = vadd.f32 %v1880_v56, %v912_v61  ;;  %v881_v16 = vmul.f32 %v804_v14, %v1786_v60  ;;  %v826_v45 = vmul.f32 %v1227_v20, %v2324_v63  ;;  %vm762_vm13 = vweird.f32 %v1225_v48 }
 0x181   : > { %v910_v33 = vmul.f32 %v1863_v59, %v874_v5  ;;  %v779_v15 = vsub.f32 1.5, %v778_v54  ;;  %v758_v18 = vmul.f32 0.5, %v757_v46  ;;  %vm832_vm14 = vweird.f32 %v1227_v20  ;;  %vm763_vm0 = vmor %vm761_vm10, %vm762_vm13 }
 0x182   : > { %980 = vst [vmem:[%s1913_s6 + $0xa8] sm:$0xff] %v948_v40  ;;  %v917_v19 = vmul.f32 %v1863_v59, %v881_v16  ;;  %1230 = vrsqrt.f32 %v2380_v25  ;;  %v827_v26 = vmul.f32 %v1227_v20, %v826_v45  ;;  %v2394_v42 = vadd.f32 1e-06, %v501_v4  ;;  %vm2415_vm1 = vmor %vm831_vm11, %vm832_vm14 }
 0x183   : > { %v946_v60 = vadd.f32 %v1880_v56, %v910_v33  ;;  %v780_v52 = vmul.f32 %v2332_v32, %v779_v15  ;;  %v759_v8 = vsub.f32 1.5, %v758_v18  ;;  %v1229_v2 = vpop.eup %1228  ;;  %v499_v41 = vmul.f32 %v2320_v39, %v1639_v38 }
 0x184   : > { %v953_v11 = vadd.f32 %v1880_v56, %v917_v19  ;;  %v502_v9 = vmul.f32 %v470_v22, %v1639_v38  ;;  %v828_v31 = vmul.f32 0.5, %v827_v26  ;;  %v806_v0 = vmul.f32 %v1229_v2, %v2357_v30 }
 0x185   : > { %978 = vst [vmem:[%s1913_s6 + $0x98] sm:$0xff] %v946_v60  ;;  %v784_v58 = vsel %vm783_vm15, %v2332_v32, %v780_v52  ;;  %v760_v1 = vmul.f32 %v1225_v48, %v759_v8  ;;  %1232 = vrsqrt.f32 %v2394_v42  ;;  %v2408_v38 = vadd.f32 1e-06, %v499_v41  ;;  %v1238_v41 = vld [vmem:[#allocation5] ss:$0 sm:$0xff] }
 0x186   : > { %985 = vst [vmem:[%s1913_s6 + $0xd0] sm:$0xff] %v953_v11  ;;  %v879_v6 = vmul.f32 %v784_v58, %v1789_v62  ;;  %v829_v39 = vsub.f32 1.5, %v828_v31  ;;  %v807_v53 = vmul.f32 %v1229_v2, %v806_v0  ;;  %v2419_v51 = vadd.f32 1e-06, %v502_v9 }
 0x187   : > { %v764_v47 = vsel %vm763_vm0, %v1225_v48, %v760_v1  ;;  %vm811_vm2 = vweird.f32 %v2357_v30  ;;  %vm812_vm3 = vweird.f32 %v1229_v2  ;;  %1234 = vrsqrt.f32 %v2408_v38 }
 0x188   : > { %v1231_v44 = vpop.eup %1230  ;;  %v915_v32 = vmul.f32 %v1863_v59, %v879_v6  ;;  %v877_v17 = vmul.f32 %v764_v47, %v1781_v21  ;;  %v830_v23 = vmul.f32 %v1227_v20, %v829_v39  ;;  %v808_v29 = vmul.f32 0.5, %v807_v53  ;;  %vm813_vm4 = vmor %vm811_vm2, %vm812_vm3  ;;  %v1239_v39 = vld [vmem:[%s2500_s2] ss:$0 sm:$0xff] }
 0x189   : > { %v786_v36 = vmul.f32 %v1231_v44, %v2380_v25  ;;  %1236 = vrsqrt.f32 %v2419_v51  ;;  %vm792_vm5 = vweird.f32 %v1231_v44  ;;  %vm791_vm6 = vweird.f32 %v2380_v25 }
 0x18a   : > { %v951_v13 = vadd.f32 %v1880_v56, %v915_v32  ;;  %v913_v21 = vmul.f32 %v1863_v59, %v877_v17  ;;  %v834_v63 = vsel %vm2415_vm1, %v1227_v20, %v830_v23  ;;  %v809_v4 = vsub.f32 1.5, %v808_v29  ;;  %vm793_vm7 = vmor %vm791_vm6, %vm792_vm5 }
 0x18b   : > { %v787_v48 = vmul.f32 %v1231_v44, %v786_v36  ;;  %v1233_v50 = vpop.eup %1232  ;;  %v884_v37 = vmul.f32 %v834_v63, %v1804_v34  ;;  %vm841_vm8 = vweird.f32 %v2394_v42  ;;  %vm821_vm13 = vweird.f32 %v2408_v38 }
 0x18c   : > { %983 = vst [vmem:[%s1913_s6 + $0xc0] sm:$0xff] %v951_v13  ;;  %v949_v10 = vadd.f32 %v1880_v56, %v913_v21  ;;  %v810_v55 = vmul.f32 %v1229_v2, %v809_v4  ;;  %v836_v43 = vmul.f32 %v1233_v50, %v2394_v42  ;;  %vm842_vm9 = vweird.f32 %v1233_v50 }
 0x18d   : > { %v788_v49 = vmul.f32 0.5, %v787_v48  ;;  %v920_v3 = vmul.f32 %v1863_v59, %v884_v37  ;;  %v1235_v5 = vpop.eup %1234  ;;  %vm843_vm10 = vmor %vm841_vm8, %vm842_vm9  ;;  %vm851_vm15 = vweird.f32 %v2419_v51 }
 0x18e   : > { %981 = vst [vmem:[%s1913_s6 + $0xb0] sm:$0xff] %v949_v10  ;;  %v814_v12 = vsel %vm813_vm4, %v1229_v2, %v810_v55  ;;  %v837_v57 = vmul.f32 %v1233_v50, %v836_v43  ;;  %v816_v40 = vmul.f32 %v1235_v5, %v2408_v38  ;;  %vm822_vm11 = vweird.f32 %v1235_v5 }
 0x18f   : > { %v789_v61 = vsub.f32 1.5, %v788_v49  ;;  %v956_v14 = vadd.f32 %v1880_v56, %v920_v3  ;;  %v882_v34 = vmul.f32 %v814_v12, %v1807_v35  ;;  %v1237_v54 = vpop.eup %1236  ;;  %vm823_vm14 = vmor %vm821_vm13, %vm822_vm11 }
 0x190   : > { %v838_v20 = vmul.f32 0.5, %v837_v57  ;;  %v846_v16 = vmul.f32 %v1237_v54, %v2419_v51  ;;  %v817_v35 = vmul.f32 %v1235_v5, %v816_v40  ;;  %vm852_vm12 = vweird.f32 %v1237_v54 }
 0x191   : > { %v790_v46 = vmul.f32 %v1231_v44, %v789_v61  ;;  %988 = vst [vmem:[%s1913_s6 + $0xe8] sm:$0xff] %v956_v14  ;;  %v918_v30 = vmul.f32 %v1863_v59, %v882_v34  ;;  %vm853_vm0 = vmor %vm851_vm15, %vm852_vm12 }
 0x192   : > { %v839_v15 = vsub.f32 1.5, %v838_v20  ;;  %v847_v45 = vmul.f32 %v1237_v54, %v846_v16  ;;  %v818_v19 = vmul.f32 0.5, %v817_v35 }
 0x193   : > { %v794_v33 = vsel %vm793_vm7, %v1231_v44, %v790_v46  ;;  %v954_v18 = vadd.f32 %v1880_v56, %v918_v30 }
 0x194   : > { %v880_v25 = vmul.f32 %v794_v33, %v1799_v24  ;;  %v840_v22 = vmul.f32 %v1233_v50, %v839_v15  ;;  %v848_v52 = vmul.f32 0.5, %v847_v45  ;;  %v819_v26 = vsub.f32 1.5, %v818_v19 }
 0x195   : > { %986 = vst [vmem:[%s1913_s6 + $0xd8] sm:$0xff] %v954_v18 }
 0x196   : > { %v916_v60 = vmul.f32 %v1863_v59, %v880_v25  ;;  %v844_v8 = vsel %vm843_vm10, %v1233_v50, %v840_v22  ;;  %v849_v42 = vsub.f32 1.5, %v848_v52  ;;  %v820_v24 = vmul.f32 %v1235_v5, %v819_v26 }
 0x197   : > { %v885_v11 = vmul.f32 %v844_v8, %v1821_v7 }
 0x198   : > { %v952_v2 = vadd.f32 %v1880_v56, %v916_v60  ;;  %v850_v9 = vmul.f32 %v1237_v54, %v849_v42  ;;  %v824_v58 = vsel %vm823_vm14, %v1235_v5, %v820_v24 }
 0x199   : > { %v921_v59 = vmul.f32 %v1238_v41, %v885_v11  ;;  %v883_v1 = vmul.f32 %v824_v58, %v1817_v27 }
 0x19a   : > { %984 = vst [vmem:[%s1913_s6 + $0xc8] sm:$0xff] %v952_v2  ;;  %v854_v31 = vsel %vm853_vm0, %v1237_v54, %v850_v9 }
 0x19b   : > { %v957_v7 = vadd.f32 %v1880_v56, %v921_v59  ;;  %v886_v0 = vmul.f32 %v854_v31, %v1829_v28  ;;  %v919_v6 = vmul.f32 %v1238_v41, %v883_v1 }
 0x19d   : > { %989 = vst [vmem:[%s1913_s6 + $0xf0] sm:$0xff] %v957_v7  ;;  %v922_v47 = vmul.f32 %v1238_v41, %v886_v0  ;;  %v955_v53 = vadd.f32 %v1239_v39, %v919_v6 }
 0x19f   : > { %v958_v56 = vadd.f32 %v1239_v39, %v922_v47  ;;  %987 = vst [vmem:[%s1913_s6 + $0xe0] sm:$0xff] %v955_v53 }
 0x1a1   : > { %990 = vst [vmem:[%s1913_s6 + $0xf8] sm:$0xff] %v958_v56 }
 0x1a2   : > { %1327 = shalt.err (!%p1324_p8)
}
 0x1a3   : > { %s1376_s10 = smov 128   ;;  %s1377_s26 = smov 8  }
 0x1a4   : > { %1114 = dma.vmem_to_hbm [thread:$0]  (%p1450_p11), %s1005_s22, 4096, %s1007_s29, %s992_s9, %s1376_s10, %s1376_s10, %s1377_s26  }
 0x1a5 PF: > { %s1021_s6 = sand.u32 1, %s1358_s12   ;;  %p2528_p9 = scmp.ge.s32.totalorder %s1370_s15, 2 }
 0x1a6   : > { %s1022_s17 = scalar_lea.sflag [#allocation4], %s1021_s6 }
 0x1a7   : > { %p1125_p10 = pnand %p2528_p9, %p1454_p12 }
 0x1a9   : > { %p1126_p1 = pneg %p1125_p10 }
 0x1ab   : > { %1353 = dma.done.wait (%p1126_p1), %s1022_s17, 4096  }
 0x1ac   : > { %1355 = vsyncadd (%p1126_p1), %s1022_s17, 4294963200  ;;  %p17_p2 = scmp.ge.s32.totalorder %s1423_s18, 4   ;;  %s2529_s12 = smov %s1362_s13 }
 0x1ad   : > { %s2530_s13 = smov %s1366_s14  ;;  %s2531_s14 = smov %s1435_s21 }
 0x1ae   : > { %s2532_s15 = smov %s1423_s18  ;;  %19 = sbr.rel (!%p17_p2) target bundleno = 6 (0x6), region = 81 }
 0x1b3   :  { %1028 = vsyncpa [#allocation3], 1 }
 0x1b4   :  { %1030 = vsyncpa [#allocation3 + $0x1], 1 }
 0x1b5   :  { %1031 = vsyncpa [#allocation6], 1 }
 0x1b6   :  { %1032 = vsyncpa [#allocation4], 1 }
 0x1b7   :  { %1034 = vsyncpa [#allocation4 + $0x1], 1 }

</bundles_post_ra>
